<compile_context>
chip_gen: v7x
topology: tpu7x:2x2x1
jax: 0.10.0
libtpu: 0.0.40
codegen_flags: <defaults>
</compile_context>

<pallas_src>
import jax
import jax.numpy as jnp
from jax.experimental import pallas as pl
from jax.experimental.pallas import tpu as pltpu


def _resnet1d_encode_kernel(xs_ref, w1a_ref, b1a_ref, w1b_ref, b1b_ref,
                            wsk_ref, bsk_ref, out_ref):
    """One batch element per grid step; refs are (C, Lo), (C, C) and (C, 1)."""
    eps = jnp.float32(1e-5)
    slope = jnp.float32(0.4)
    C, _ = xs_ref.shape

    xs = xs_ref[...]                       # (C, Lo) raw stride-2 gathered input

    def conv1x1(w, b, h):
        # 1x1 conv as C broadcast-FMA outer products on the VPU.  With C this small the
        # MXU is pure push/pop latency (8 of 256 rows), and exact f32 VPU math keeps the
        # result bit-faithful to an f32 reference.
        # TODO(synk): for realistic filter counts (C >= 128) replace with a single
        #             jnp.dot per conv (bf16 inputs, preferred_element_type=f32).
        acc = jnp.broadcast_to(b, h.shape)                 # bias, broadcast across lanes
        for c in range(C):                                 # static, unrolled
            acc = acc + w[:, c:c + 1] * h[c:c + 1, :]      # (C,1) x (1,Lo) outer FMA
        return acc

    def norm_lrelu(h):
        # InstanceNorm1d (affine=False, biased variance, eps=1e-5) + leaky_relu(0.4).
        # Single fused reduction over the length axis — no slicing, no concatenate.
        mu = jnp.mean(h, axis=-1, keepdims=True)
        d = h - mu
        var = jnp.mean(d * d, axis=-1, keepdims=True)
        y = d * jax.lax.rsqrt(var + eps)
        return jnp.where(y >= 0, y, slope * y)

    w1a = w1a_ref[...]; b1a = b1a_ref[...]
    w1b = w1b_ref[...]; b1b = b1b_ref[...]
    wsk = wsk_ref[...]; bsk = bsk_ref[...]

    # relu -> conv1a (the stride-2 is already folded into the gathered input)
    h = conv1x1(w1a, b1a, jnp.maximum(xs, 0.0))
    h = norm_lrelu(h)
    # conv1b (1x1, stride 1)
    h = conv1x1(w1b, b1b, h)
    h = norm_lrelu(h)
    # skip_conv (1x1, stride 2) on the RAW (non-relu'd) input, residual add, final relu
    res = conv1x1(wsk, bsk, xs)
    out_ref[...] = jnp.maximum(h + res, 0.0)


def resnet1d_block_encode(x, params, kernel_size):
    """Fused 'encode' forward. x: (N, C, L) float32 in PyTorch NCL layout."""
    if kernel_size != 1:
        raise NotImplementedError(
            "Only kernel_size=1 is supported; it is the only kernel_size for which "
            "the PyTorch module's residual add is shape-valid.")
    N, C, L = x.shape
    stride = 2
    Lo = (L - 1) // stride + 1            # output length of all three stride-2 reads

    # Single de-duplicated, layout-preserving gather: every conv only ever reads the
    # stride-2 positions, and it stays in NCL layout so there are NO transposes on
    # either side of the pallas_call.
    xs = x[:, :, ::stride]                # (N, C, Lo)

    # PyTorch Conv1d weights (O, I, 1) -> (O, I); biases -> (C, 1) column vectors.
    w1a = params["w1a"].reshape(C, C)
    w1b = params["w1b"].reshape(C, C)
    wsk = params["wsk"].reshape(C, C)
    b1a = params["b1a"].reshape(C, 1)
    b1b = params["b1b"].reshape(C, 1)
    bsk = params["bsk"].reshape(C, 1)

    batch_block = lambda i: (i, 0, 0)     # one batch element per grid step
    resident = lambda i: (0, 0)           # weights/biases: same block -> no re-DMA

    cost = pl.CostEstimate(
        flops=int(N * (3 * 2 * C * C * Lo + 10 * C * Lo)),
        transcendentals=int(2 * N * C),
        bytes_accessed=int(4 * (2 * N * C * Lo + 3 * C * C + 3 * C)),
    )

    out = pl.pallas_call(
        _resnet1d_encode_kernel,
        out_shape=jax.ShapeDtypeStruct((N, C, Lo), jnp.float32),
        grid=(N,),
        in_specs=[
            pl.BlockSpec((None, C, Lo), batch_block),   # xs (squeezed batch dim)
            pl.BlockSpec((C, C), resident),             # w1a
            pl.BlockSpec((C, 1), resident),             # b1a
            pl.BlockSpec((C, C), resident),             # w1b
            pl.BlockSpec((C, 1), resident),             # b1b
            pl.BlockSpec((C, C), resident),             # wsk
            pl.BlockSpec((C, 1), resident),             # bsk
        ],
        out_specs=pl.BlockSpec((None, C, Lo), batch_block),
        # "parallel" batch axis: v7x's two TensorCores split the batch; on single-TC
        # v5e/v6e it is simply a sequential loop (no lane-width is sacrificed).
        compiler_params=pltpu.CompilerParams(dimension_semantics=("parallel",)),
        cost_estimate=cost,
    )(xs, w1a, b1a, w1b, b1b, wsk, bsk)

    return out                             # (N, C, Lo), PyTorch layout, no un-transpose


# ---------------- pure-JAX reference mirroring the PyTorch forward ----------------
def _reference_forward(x, p):
    high = jax.lax.Precision.HIGHEST       # keep the reference at full f32 accuracy

    def conv1x1(h, w, b, stride):
        hs = h[:, :, ::stride]
        y = jnp.einsum('oc,ncl->nol', w[:, :, 0], hs, precision=high)
        return y + b[None, :, None]

    def inorm(h, eps=1e-5):
        mu = jnp.mean(h, axis=-1, keepdims=True)
        var = jnp.var(h, axis=-1, keepdims=True)
        return (h - mu) / jnp.sqrt(var + eps)

    def lrelu(h):
        return jnp.where(h >= 0, h, 0.4 * h)

    h = jax.nn.relu(x)
    h = lrelu(inorm(conv1x1(h, p["w1a"], p["b1a"], 2)))
    h = lrelu(inorm(conv1x1(h, p["w1b"], p["b1b"], 1)))
    res = conv1x1(x, p["wsk"], p["bsk"], 2)
    return jax.nn.relu(h + res)


if __name__ == "__main__":
    # filters=8, kernel_size=1 (the only shape-valid kernel_size for this module),
    # batch=4, length=256  ->  Lo=128: lane-dense (C, 128) blocks, unmasked stores.
    N, C, L, K = 4, 8, 256, 1

    key = jax.random.PRNGKey(0)
    ks = jax.random.split(key, 7)
    params = {
        "w1a": jax.random.normal(ks[0], (C, C, K), jnp.float32) * 0.3,
        "b1a": jax.random.normal(ks[1], (C,), jnp.float32) * 0.1,
        "w1b": jax.random.normal(ks[2], (C, C, K), jnp.float32) * 0.3,
        "b1b": jax.random.normal(ks[3], (C,), jnp.float32) * 0.1,
        "wsk": jax.random.normal(ks[4], (C, C, 1), jnp.float32) * 0.3,
        "bsk": jax.random.normal(ks[5], (C,), jnp.float32) * 0.1,
    }
    x = jax.random.normal(ks[6], (N, C, L), jnp.float32)

    out = jax.block_until_ready(resnet1d_block_encode(x, params, K))

    ref = _reference_forward(x, params)
    assert out.shape == ref.shape, (out.shape, ref.shape)
    assert jnp.allclose(out, ref, atol=1e-4, rtol=1e-4), float(
        jnp.max(jnp.abs(out - ref)))

    print("KERNEL_OK")
</pallas_src>

<mosaic_0001>
module attributes {stable_mosaic.version = 11 : i64} {
  func.func @_resnet1d_encode_kernel(%arg0: i32, %arg1: memref<1x8x128xf32, #tpu.memory_space<vmem>>, %arg2: memref<8x8xf32, #tpu.memory_space<vmem>>, %arg3: memref<8x1xf32, #tpu.memory_space<vmem>>, %arg4: memref<8x8xf32, #tpu.memory_space<vmem>>, %arg5: memref<8x1xf32, #tpu.memory_space<vmem>>, %arg6: memref<8x8xf32, #tpu.memory_space<vmem>>, %arg7: memref<8x1xf32, #tpu.memory_space<vmem>>, %arg8: memref<1x8x128xf32, #tpu.memory_space<vmem>>) attributes {dimension_semantics = [#tpu.dimension_semantics<parallel>], iteration_bounds = array<i64: 4>, scalar_prefetch = 0 : i64, scratch_operands = 0 : i64, tpu.core_type = #tpu.core_type<tc>, window_params = [{transform_indices = @transform_0, window_bounds = array<i64: 1, 8, 128>}, {pipeline_mode = #tpu.pipeline_mode<synchronous>, transform_indices = @transform_1, window_bounds = array<i64: 8, 8>}, {pipeline_mode = #tpu.pipeline_mode<synchronous>, transform_indices = @transform_2, window_bounds = array<i64: 8, 1>}, {pipeline_mode = #tpu.pipeline_mode<synchronous>, transform_indices = @transform_3, window_bounds = array<i64: 8, 8>}, {pipeline_mode = #tpu.pipeline_mode<synchronous>, transform_indices = @transform_4, window_bounds = array<i64: 8, 1>}, {pipeline_mode = #tpu.pipeline_mode<synchronous>, transform_indices = @transform_5, window_bounds = array<i64: 8, 8>}, {pipeline_mode = #tpu.pipeline_mode<synchronous>, transform_indices = @transform_6, window_bounds = array<i64: 8, 1>}, {transform_indices = @transform_7, window_bounds = array<i64: 1, 8, 128>}]} {
    %c0 = arith.constant 0 : index
    %c0_0 = arith.constant 0 : index
    %c0_1 = arith.constant 0 : index
    %0 = vector.load %arg1[%c0, %c0_0, %c0_1] : memref<1x8x128xf32, #tpu.memory_space<vmem>>, vector<1x8x128xf32>
    %1 = vector.shape_cast %0 : vector<1x8x128xf32> to vector<8x128xf32>
    %c0_2 = arith.constant 0 : index
    %c0_3 = arith.constant 0 : index
    %2 = vector.load %arg2[%c0_2, %c0_3] : memref<8x8xf32, #tpu.memory_space<vmem>>, vector<8x8xf32>
    %c0_4 = arith.constant 0 : index
    %c0_5 = arith.constant 0 : index
    %3 = vector.load %arg3[%c0_4, %c0_5] : memref<8x1xf32, #tpu.memory_space<vmem>>, vector<8x1xf32>
    %c0_6 = arith.constant 0 : index
    %c0_7 = arith.constant 0 : index
    %4 = vector.load %arg4[%c0_6, %c0_7] : memref<8x8xf32, #tpu.memory_space<vmem>>, vector<8x8xf32>
    %c0_8 = arith.constant 0 : index
    %c0_9 = arith.constant 0 : index
    %5 = vector.load %arg5[%c0_8, %c0_9] : memref<8x1xf32, #tpu.memory_space<vmem>>, vector<8x1xf32>
    %c0_10 = arith.constant 0 : index
    %c0_11 = arith.constant 0 : index
    %6 = vector.load %arg6[%c0_10, %c0_11] : memref<8x8xf32, #tpu.memory_space<vmem>>, vector<8x8xf32>
    %c0_12 = arith.constant 0 : index
    %c0_13 = arith.constant 0 : index
    %7 = vector.load %arg7[%c0_12, %c0_13] : memref<8x1xf32, #tpu.memory_space<vmem>>, vector<8x1xf32>
    %cst = arith.constant 0.000000e+00 : f32
    %8 = vector.broadcast %cst : f32 to vector<8x128xf32>
    %9 = arith.maximumf %1, %8 : vector<8x128xf32>
    %10 = vector.shape_cast %3 : vector<8x1xf32> to vector<8x1xf32>
    %11 = vector.broadcast %10 : vector<8x1xf32> to vector<8x128xf32>
    %12 = vector.extract_strided_slice %2 {offsets = [0, 0], sizes = [8, 1], strides = [1, 1]} : vector<8x8xf32> to vector<8x1xf32>
    %13 = vector.extract_strided_slice %9 {offsets = [0, 0], sizes = [1, 128], strides = [1, 1]} : vector<8x128xf32> to vector<1x128xf32>
    %14 = vector.broadcast %12 : vector<8x1xf32> to vector<8x128xf32>
    %15 = vector.broadcast %13 : vector<1x128xf32> to vector<8x128xf32>
    %16 = arith.mulf %14, %15 : vector<8x128xf32>
    %17 = arith.addf %11, %16 : vector<8x128xf32>
    %18 = vector.extract_strided_slice %2 {offsets = [0, 1], sizes = [8, 1], strides = [1, 1]} : vector<8x8xf32> to vector<8x1xf32>
    %19 = vector.extract_strided_slice %9 {offsets = [1, 0], sizes = [1, 128], strides = [1, 1]} : vector<8x128xf32> to vector<1x128xf32>
    %20 = vector.broadcast %18 : vector<8x1xf32> to vector<8x128xf32>
    %21 = vector.broadcast %19 : vector<1x128xf32> to vector<8x128xf32>
    %22 = arith.mulf %20, %21 : vector<8x128xf32>
    %23 = arith.addf %17, %22 : vector<8x128xf32>
    %24 = vector.extract_strided_slice %2 {offsets = [0, 2], sizes = [8, 1], strides = [1, 1]} : vector<8x8xf32> to vector<8x1xf32>
    %25 = vector.extract_strided_slice %9 {offsets = [2, 0], sizes = [1, 128], strides = [1, 1]} : vector<8x128xf32> to vector<1x128xf32>
    %26 = vector.broadcast %24 : vector<8x1xf32> to vector<8x128xf32>
    %27 = vector.broadcast %25 : vector<1x128xf32> to vector<8x128xf32>
    %28 = arith.mulf %26, %27 : vector<8x128xf32>
    %29 = arith.addf %23, %28 : vector<8x128xf32>
    %30 = vector.extract_strided_slice %2 {offsets = [0, 3], sizes = [8, 1], strides = [1, 1]} : vector<8x8xf32> to vector<8x1xf32>
    %31 = vector.extract_strided_slice %9 {offsets = [3, 0], sizes = [1, 128], strides = [1, 1]} : vector<8x128xf32> to vector<1x128xf32>
    %32 = vector.broadcast %30 : vector<8x1xf32> to vector<8x128xf32>
    %33 = vector.broadcast %31 : vector<1x128xf32> to vector<8x128xf32>
    %34 = arith.mulf %32, %33 : vector<8x128xf32>
    %35 = arith.addf %29, %34 : vector<8x128xf32>
    %36 = vector.extract_strided_slice %2 {offsets = [0, 4], sizes = [8, 1], strides = [1, 1]} : vector<8x8xf32> to vector<8x1xf32>
    %37 = vector.extract_strided_slice %9 {offsets = [4, 0], sizes = [1, 128], strides = [1, 1]} : vector<8x128xf32> to vector<1x128xf32>
    %38 = vector.broadcast %36 : vector<8x1xf32> to vector<8x128xf32>
    %39 = vector.broadcast %37 : vector<1x128xf32> to vector<8x128xf32>
    %40 = arith.mulf %38, %39 : vector<8x128xf32>
    %41 = arith.addf %35, %40 : vector<8x128xf32>
    %42 = vector.extract_strided_slice %2 {offsets = [0, 5], sizes = [8, 1], strides = [1, 1]} : vector<8x8xf32> to vector<8x1xf32>
    %43 = vector.extract_strided_slice %9 {offsets = [5, 0], sizes = [1, 128], strides = [1, 1]} : vector<8x128xf32> to vector<1x128xf32>
    %44 = vector.broadcast %42 : vector<8x1xf32> to vector<8x128xf32>
    %45 = vector.broadcast %43 : vector<1x128xf32> to vector<8x128xf32>
    %46 = arith.mulf %44, %45 : vector<8x128xf32>
    %47 = arith.addf %41, %46 : vector<8x128xf32>
    %48 = vector.extract_strided_slice %2 {offsets = [0, 6], sizes = [8, 1], strides = [1, 1]} : vector<8x8xf32> to vector<8x1xf32>
    %49 = vector.extract_strided_slice %9 {offsets = [6, 0], sizes = [1, 128], strides = [1, 1]} : vector<8x128xf32> to vector<1x128xf32>
    %50 = vector.broadcast %48 : vector<8x1xf32> to vector<8x128xf32>
    %51 = vector.broadcast %49 : vector<1x128xf32> to vector<8x128xf32>
    %52 = arith.mulf %50, %51 : vector<8x128xf32>
    %53 = arith.addf %47, %52 : vector<8x128xf32>
    %54 = vector.extract_strided_slice %2 {offsets = [0, 7], sizes = [8, 1], strides = [1, 1]} : vector<8x8xf32> to vector<8x1xf32>
    %55 = vector.extract_strided_slice %9 {offsets = [7, 0], sizes = [1, 128], strides = [1, 1]} : vector<8x128xf32> to vector<1x128xf32>
    %56 = vector.broadcast %54 : vector<8x1xf32> to vector<8x128xf32>
    %57 = vector.broadcast %55 : vector<1x128xf32> to vector<8x128xf32>
    %58 = arith.mulf %56, %57 : vector<8x128xf32>
    %59 = arith.addf %53, %58 : vector<8x128xf32>
    %cst_14 = arith.constant dense<0.000000e+00> : vector<8xf32>
    %60 = vector.multi_reduction <add>, %59, %cst_14 [1] : vector<8x128xf32> to vector<8xf32>
    %61 = vector.shape_cast %60 : vector<8xf32> to vector<8x1xf32>
    %cst_15 = arith.constant 1.280000e+02 : f32
    %62 = vector.broadcast %cst_15 : f32 to vector<8x1xf32>
    %63 = arith.divf %61, %62 : vector<8x1xf32>
    %64 = vector.broadcast %63 : vector<8x1xf32> to vector<8x128xf32>
    %65 = arith.subf %59, %64 : vector<8x128xf32>
    %66 = arith.mulf %65, %65 : vector<8x128xf32>
    %cst_16 = arith.constant dense<0.000000e+00> : vector<8xf32>
    %67 = vector.multi_reduction <add>, %66, %cst_16 [1] : vector<8x128xf32> to vector<8xf32>
    %68 = vector.shape_cast %67 : vector<8xf32> to vector<8x1xf32>
    %cst_17 = arith.constant 1.280000e+02 : f32
    %69 = vector.broadcast %cst_17 : f32 to vector<8x1xf32>
    %70 = arith.divf %68, %69 : vector<8x1xf32>
    %cst_18 = arith.constant 9.99999974E-6 : f32
    %71 = vector.broadcast %cst_18 : f32 to vector<8x1xf32>
    %72 = arith.addf %70, %71 : vector<8x1xf32>
    %73 = math.rsqrt %72 : vector<8x1xf32>
    %74 = vector.broadcast %73 : vector<8x1xf32> to vector<8x128xf32>
    %75 = arith.mulf %65, %74 : vector<8x128xf32>
    %cst_19 = arith.constant 0.000000e+00 : f32
    %76 = vector.broadcast %cst_19 : f32 to vector<8x128xf32>
    %77 = arith.cmpf oge, %75, %76 : vector<8x128xf32>
    %cst_20 = arith.constant 4.000000e-01 : f32
    %78 = vector.broadcast %cst_20 : f32 to vector<8x128xf32>
    %79 = arith.mulf %78, %75 : vector<8x128xf32>
    %80 = arith.select %77, %75, %79 : vector<8x128xi1>, vector<8x128xf32>
    %81 = vector.shape_cast %5 : vector<8x1xf32> to vector<8x1xf32>
    %82 = vector.broadcast %81 : vector<8x1xf32> to vector<8x128xf32>
    %83 = vector.extract_strided_slice %4 {offsets = [0, 0], sizes = [8, 1], strides = [1, 1]} : vector<8x8xf32> to vector<8x1xf32>
    %84 = vector.extract_strided_slice %80 {offsets = [0, 0], sizes = [1, 128], strides = [1, 1]} : vector<8x128xf32> to vector<1x128xf32>
    %85 = vector.broadcast %83 : vector<8x1xf32> to vector<8x128xf32>
    %86 = vector.broadcast %84 : vector<1x128xf32> to vector<8x128xf32>
    %87 = arith.mulf %85, %86 : vector<8x128xf32>
    %88 = arith.addf %82, %87 : vector<8x128xf32>
    %89 = vector.extract_strided_slice %4 {offsets = [0, 1], sizes = [8, 1], strides = [1, 1]} : vector<8x8xf32> to vector<8x1xf32>
    %90 = vector.extract_strided_slice %80 {offsets = [1, 0], sizes = [1, 128], strides = [1, 1]} : vector<8x128xf32> to vector<1x128xf32>
    %91 = vector.broadcast %89 : vector<8x1xf32> to vector<8x128xf32>
    %92 = vector.broadcast %90 : vector<1x128xf32> to vector<8x128xf32>
    %93 = arith.mulf %91, %92 : vector<8x128xf32>
    %94 = arith.addf %88, %93 : vector<8x128xf32>
    %95 = vector.extract_strided_slice %4 {offsets = [0, 2], sizes = [8, 1], strides = [1, 1]} : vector<8x8xf32> to vector<8x1xf32>
    %96 = vector.extract_strided_slice %80 {offsets = [2, 0], sizes = [1, 128], strides = [1, 1]} : vector<8x128xf32> to vector<1x128xf32>
    %97 = vector.broadcast %95 : vector<8x1xf32> to vector<8x128xf32>
    %98 = vector.broadcast %96 : vector<1x128xf32> to vector<8x128xf32>
    %99 = arith.mulf %97, %98 : vector<8x128xf32>
    %100 = arith.addf %94, %99 : vector<8x128xf32>
    %101 = vector.extract_strided_slice %4 {offsets = [0, 3], sizes = [8, 1], strides = [1, 1]} : vector<8x8xf32> to vector<8x1xf32>
    %102 = vector.extract_strided_slice %80 {offsets = [3, 0], sizes = [1, 128], strides = [1, 1]} : vector<8x128xf32> to vector<1x128xf32>
    %103 = vector.broadcast %101 : vector<8x1xf32> to vector<8x128xf32>
    %104 = vector.broadcast %102 : vector<1x128xf32> to vector<8x128xf32>
    %105 = arith.mulf %103, %104 : vector<8x128xf32>
    %106 = arith.addf %100, %105 : vector<8x128xf32>
    %107 = vector.extract_strided_slice %4 {offsets = [0, 4], sizes = [8, 1], strides = [1, 1]} : vector<8x8xf32> to vector<8x1xf32>
    %108 = vector.extract_strided_slice %80 {offsets = [4, 0], sizes = [1, 128], strides = [1, 1]} : vector<8x128xf32> to vector<1x128xf32>
    %109 = vector.broadcast %107 : vector<8x1xf32> to vector<8x128xf32>
    %110 = vector.broadcast %108 : vector<1x128xf32> to vector<8x128xf32>
    %111 = arith.mulf %109, %110 : vector<8x128xf32>
    %112 = arith.addf %106, %111 : vector<8x128xf32>
    %113 = vector.extract_strided_slice %4 {offsets = [0, 5], sizes = [8, 1], strides = [1, 1]} : vector<8x8xf32> to vector<8x1xf32>
    %114 = vector.extract_strided_slice %80 {offsets = [5, 0], sizes = [1, 128], strides = [1, 1]} : vector<8x128xf32> to vector<1x128xf32>
    %115 = vector.broadcast %113 : vector<8x1xf32> to vector<8x128xf32>
    %116 = vector.broadcast %114 : vector<1x128xf32> to vector<8x128xf32>
    %117 = arith.mulf %115, %116 : vector<8x128xf32>
    %118 = arith.addf %112, %117 : vector<8x128xf32>
    %119 = vector.extract_strided_slice %4 {offsets = [0, 6], sizes = [8, 1], strides = [1, 1]} : vector<8x8xf32> to vector<8x1xf32>
    %120 = vector.extract_strided_slice %80 {offsets = [6, 0], sizes = [1, 128], strides = [1, 1]} : vector<8x128xf32> to vector<1x128xf32>
    %121 = vector.broadcast %119 : vector<8x1xf32> to vector<8x128xf32>
    %122 = vector.broadcast %120 : vector<1x128xf32> to vector<8x128xf32>
    %123 = arith.mulf %121, %122 : vector<8x128xf32>
    %124 = arith.addf %118, %123 : vector<8x128xf32>
    %125 = vector.extract_strided_slice %4 {offsets = [0, 7], sizes = [8, 1], strides = [1, 1]} : vector<8x8xf32> to vector<8x1xf32>
    %126 = vector.extract_strided_slice %80 {offsets = [7, 0], sizes = [1, 128], strides = [1, 1]} : vector<8x128xf32> to vector<1x128xf32>
    %127 = vector.broadcast %125 : vector<8x1xf32> to vector<8x128xf32>
    %128 = vector.broadcast %126 : vector<1x128xf32> to vector<8x128xf32>
    %129 = arith.mulf %127, %128 : vector<8x128xf32>
    %130 = arith.addf %124, %129 : vector<8x128xf32>
    %cst_21 = arith.constant dense<0.000000e+00> : vector<8xf32>
    %131 = vector.multi_reduction <add>, %130, %cst_21 [1] : vector<8x128xf32> to vector<8xf32>
    %132 = vector.shape_cast %131 : vector<8xf32> to vector<8x1xf32>
    %cst_22 = arith.constant 1.280000e+02 : f32
    %133 = vector.broadcast %cst_22 : f32 to vector<8x1xf32>
    %134 = arith.divf %132, %133 : vector<8x1xf32>
    %135 = vector.broadcast %134 : vector<8x1xf32> to vector<8x128xf32>
    %136 = arith.subf %130, %135 : vector<8x128xf32>
    %137 = arith.mulf %136, %136 : vector<8x128xf32>
    %cst_23 = arith.constant dense<0.000000e+00> : vector<8xf32>
    %138 = vector.multi_reduction <add>, %137, %cst_23 [1] : vector<8x128xf32> to vector<8xf32>
    %139 = vector.shape_cast %138 : vector<8xf32> to vector<8x1xf32>
    %cst_24 = arith.constant 1.280000e+02 : f32
    %140 = vector.broadcast %cst_24 : f32 to vector<8x1xf32>
    %141 = arith.divf %139, %140 : vector<8x1xf32>
    %cst_25 = arith.constant 9.99999974E-6 : f32
    %142 = vector.broadcast %cst_25 : f32 to vector<8x1xf32>
    %143 = arith.addf %141, %142 : vector<8x1xf32>
    %144 = math.rsqrt %143 : vector<8x1xf32>
    %145 = vector.broadcast %144 : vector<8x1xf32> to vector<8x128xf32>
    %146 = arith.mulf %136, %145 : vector<8x128xf32>
    %cst_26 = arith.constant 0.000000e+00 : f32
    %147 = vector.broadcast %cst_26 : f32 to vector<8x128xf32>
    %148 = arith.cmpf oge, %146, %147 : vector<8x128xf32>
    %cst_27 = arith.constant 4.000000e-01 : f32
    %149 = vector.broadcast %cst_27 : f32 to vector<8x128xf32>
    %150 = arith.mulf %149, %146 : vector<8x128xf32>
    %151 = arith.select %148, %146, %150 : vector<8x128xi1>, vector<8x128xf32>
    %152 = vector.shape_cast %7 : vector<8x1xf32> to vector<8x1xf32>
    %153 = vector.broadcast %152 : vector<8x1xf32> to vector<8x128xf32>
    %154 = vector.extract_strided_slice %6 {offsets = [0, 0], sizes = [8, 1], strides = [1, 1]} : vector<8x8xf32> to vector<8x1xf32>
    %155 = vector.extract_strided_slice %1 {offsets = [0, 0], sizes = [1, 128], strides = [1, 1]} : vector<8x128xf32> to vector<1x128xf32>
    %156 = vector.broadcast %154 : vector<8x1xf32> to vector<8x128xf32>
    %157 = vector.broadcast %155 : vector<1x128xf32> to vector<8x128xf32>
    %158 = arith.mulf %156, %157 : vector<8x128xf32>
    %159 = arith.addf %153, %158 : vector<8x128xf32>
    %160 = vector.extract_strided_slice %6 {offsets = [0, 1], sizes = [8, 1], strides = [1, 1]} : vector<8x8xf32> to vector<8x1xf32>
    %161 = vector.extract_strided_slice %1 {offsets = [1, 0], sizes = [1, 128], strides = [1, 1]} : vector<8x128xf32> to vector<1x128xf32>
    %162 = vector.broadcast %160 : vector<8x1xf32> to vector<8x128xf32>
    %163 = vector.broadcast %161 : vector<1x128xf32> to vector<8x128xf32>
    %164 = arith.mulf %162, %163 : vector<8x128xf32>
    %165 = arith.addf %159, %164 : vector<8x128xf32>
    %166 = vector.extract_strided_slice %6 {offsets = [0, 2], sizes = [8, 1], strides = [1, 1]} : vector<8x8xf32> to vector<8x1xf32>
    %167 = vector.extract_strided_slice %1 {offsets = [2, 0], sizes = [1, 128], strides = [1, 1]} : vector<8x128xf32> to vector<1x128xf32>
    %168 = vector.broadcast %166 : vector<8x1xf32> to vector<8x128xf32>
    %169 = vector.broadcast %167 : vector<1x128xf32> to vector<8x128xf32>
    %170 = arith.mulf %168, %169 : vector<8x128xf32>
    %171 = arith.addf %165, %170 : vector<8x128xf32>
    %172 = vector.extract_strided_slice %6 {offsets = [0, 3], sizes = [8, 1], strides = [1, 1]} : vector<8x8xf32> to vector<8x1xf32>
    %173 = vector.extract_strided_slice %1 {offsets = [3, 0], sizes = [1, 128], strides = [1, 1]} : vector<8x128xf32> to vector<1x128xf32>
    %174 = vector.broadcast %172 : vector<8x1xf32> to vector<8x128xf32>
    %175 = vector.broadcast %173 : vector<1x128xf32> to vector<8x128xf32>
    %176 = arith.mulf %174, %175 : vector<8x128xf32>
    %177 = arith.addf %171, %176 : vector<8x128xf32>
    %178 = vector.extract_strided_slice %6 {offsets = [0, 4], sizes = [8, 1], strides = [1, 1]} : vector<8x8xf32> to vector<8x1xf32>
    %179 = vector.extract_strided_slice %1 {offsets = [4, 0], sizes = [1, 128], strides = [1, 1]} : vector<8x128xf32> to vector<1x128xf32>
    %180 = vector.broadcast %178 : vector<8x1xf32> to vector<8x128xf32>
    %181 = vector.broadcast %179 : vector<1x128xf32> to vector<8x128xf32>
    %182 = arith.mulf %180, %181 : vector<8x128xf32>
    %183 = arith.addf %177, %182 : vector<8x128xf32>
    %184 = vector.extract_strided_slice %6 {offsets = [0, 5], sizes = [8, 1], strides = [1, 1]} : vector<8x8xf32> to vector<8x1xf32>
    %185 = vector.extract_strided_slice %1 {offsets = [5, 0], sizes = [1, 128], strides = [1, 1]} : vector<8x128xf32> to vector<1x128xf32>
    %186 = vector.broadcast %184 : vector<8x1xf32> to vector<8x128xf32>
    %187 = vector.broadcast %185 : vector<1x128xf32> to vector<8x128xf32>
    %188 = arith.mulf %186, %187 : vector<8x128xf32>
    %189 = arith.addf %183, %188 : vector<8x128xf32>
    %190 = vector.extract_strided_slice %6 {offsets = [0, 6], sizes = [8, 1], strides = [1, 1]} : vector<8x8xf32> to vector<8x1xf32>
    %191 = vector.extract_strided_slice %1 {offsets = [6, 0], sizes = [1, 128], strides = [1, 1]} : vector<8x128xf32> to vector<1x128xf32>
    %192 = vector.broadcast %190 : vector<8x1xf32> to vector<8x128xf32>
    %193 = vector.broadcast %191 : vector<1x128xf32> to vector<8x128xf32>
    %194 = arith.mulf %192, %193 : vector<8x128xf32>
    %195 = arith.addf %189, %194 : vector<8x128xf32>
    %196 = vector.extract_strided_slice %6 {offsets = [0, 7], sizes = [8, 1], strides = [1, 1]} : vector<8x8xf32> to vector<8x1xf32>
    %197 = vector.extract_strided_slice %1 {offsets = [7, 0], sizes = [1, 128], strides = [1, 1]} : vector<8x128xf32> to vector<1x128xf32>
    %198 = vector.broadcast %196 : vector<8x1xf32> to vector<8x128xf32>
    %199 = vector.broadcast %197 : vector<1x128xf32> to vector<8x128xf32>
    %200 = arith.mulf %198, %199 : vector<8x128xf32>
    %201 = arith.addf %195, %200 : vector<8x128xf32>
    %202 = arith.addf %151, %201 : vector<8x128xf32>
    %cst_28 = arith.constant 0.000000e+00 : f32
    %203 = vector.broadcast %cst_28 : f32 to vector<8x128xf32>
    %204 = arith.maximumf %202, %203 : vector<8x128xf32>
    %c0_29 = arith.constant 0 : index
    %c0_30 = arith.constant 0 : index
    %c0_31 = arith.constant 0 : index
    %205 = vector.load %arg8[%c0_29, %c0_30, %c0_31] : memref<1x8x128xf32, #tpu.memory_space<vmem>>, vector<1x8x128xf32>
    %206 = vector.shape_cast %205 : vector<1x8x128xf32> to vector<8x128xf32>
    %207 = vector.shape_cast %204 : vector<8x128xf32> to vector<1x8x128xf32>
    tpu.vector_store %arg8[%c0_29, %c0_30, %c0_31], %207 {strides = array<i32>} : memref<1x8x128xf32, #tpu.memory_space<vmem>>, vector<1x8x128xf32>,
    return
  }
  func.func @transform_0(%arg0: i32) -> (i32, i32, i32) {
    %c0_i32 = arith.constant 0 : i32
    %c0_i32_0 = arith.constant 0 : i32
    %c0_i32_1 = arith.constant 0 : i32
    return %arg0, %c0_i32, %c0_i32_0 : i32, i32, i32
  }
  func.func @transform_1(%arg0: i32) -> (i32, i32) {
    %c0_i32 = arith.constant 0 : i32
    %c0_i32_0 = arith.constant 0 : i32
    %c0_i32_1 = arith.constant 0 : i32
    return %c0_i32, %c0_i32_0 : i32, i32
  }
  func.func @transform_2(%arg0: i32) -> (i32, i32) {
    %c0_i32 = arith.constant 0 : i32
    %c0_i32_0 = arith.constant 0 : i32
    %c0_i32_1 = arith.constant 0 : i32
    return %c0_i32, %c0_i32_0 : i32, i32
  }
  func.func @transform_3(%arg0: i32) -> (i32, i32) {
    %c0_i32 = arith.constant 0 : i32
    %c0_i32_0 = arith.constant 0 : i32
    %c0_i32_1 = arith.constant 0 : i32
    return %c0_i32, %c0_i32_0 : i32, i32
  }
  func.func @transform_4(%arg0: i32) -> (i32, i32) {
    %c0_i32 = arith.constant 0 : i32
    %c0_i32_0 = arith.constant 0 : i32
    %c0_i32_1 = arith.constant 0 : i32
    return %c0_i32, %c0_i32_0 : i32, i32
  }
  func.func @transform_5(%arg0: i32) -> (i32, i32) {
    %c0_i32 = arith.constant 0 : i32
    %c0_i32_0 = arith.constant 0 : i32
    %c0_i32_1 = arith.constant 0 : i32
    return %c0_i32, %c0_i32_0 : i32, i32
  }
  func.func @transform_6(%arg0: i32) -> (i32, i32) {
    %c0_i32 = arith.constant 0 : i32
    %c0_i32_0 = arith.constant 0 : i32
    %c0_i32_1 = arith.constant 0 : i32
    return %c0_i32, %c0_i32_0 : i32, i32
  }
  func.func @transform_7(%arg0: i32) -> (i32, i32, i32) {
    %c0_i32 = arith.constant 0 : i32
    %c0_i32_0 = arith.constant 0 : i32
    %c0_i32_1 = arith.constant 0 : i32
    return %arg0, %c0_i32, %c0_i32_0 : i32, i32, i32
  }
}

</mosaic_0001>

<bundles_post_ra>
// kernel: tpu_custom_call.1
= control target key start
LH: loop header
LB: loop body
LE: loop exit
PB: predicated region body
PF: predicated region fallthrough
CT: control target
= control target key end

     0   :  { %12 = vsyncpa [#allocation3], 0  ;;  %s1179_s0 = inlined_call_operand.hbm [shape: f32[4,8,128], index: 0, kind: input, shape index: {}]   ;;  %s1180_s1 = inlined_call_operand.vmem [shape: f32[8,8], index: 1, kind: input, shape index: {}]   ;;  %s1181_s2 = inlined_call_operand.vmem [shape: f32[8,1], index: 2, kind: input, shape index: {}]   ;;  %s1182_s3 = inlined_call_operand.vmem [shape: f32[8,8], index: 3, kind: input, shape index: {}]   ;;  %s1183_s4 = inlined_call_operand.vmem [shape: f32[8,1], index: 4, kind: input, shape index: {}]   ;;  %s1184_s5 = inlined_call_operand.vmem [shape: f32[8,8], index: 5, kind: input, shape index: {}]   ;;  %s1185_s6 = inlined_call_operand.vmem [shape: f32[8,1], index: 6, kind: input, shape index: {}]   ;;  %s1186_s7 = inlined_call_operand.hbm [shape: f32[4,8,128], index: 7, kind: output, shape index: {}]  }
   0x1   :  { %14 = vsyncpa [#allocation3 + $0x1], 0 }
   0x2   :  { %15 = vsyncpa [#allocation4], 0 }
   0x3   :  { %17 = vsyncpa [#allocation4 + $0x1], 0  ;;  %s919_s24 = smov 0   ;;  %s921_s25 = smov 0  }
   0x4   :  { %s923_s26 = smov 0   ;;  %s925_s27 = smov 0  }
   0x5 LB: > { %s940_s28 = sadd.s32 4294967295, %s867_s27   ;;  %s676_s29 = sadd.s32 4294967294, %s867_s27   ;;  %s867_s27 = sphi %s925_s27, %s1200_s27   ;;  %s863_s26 = sphi %s923_s26, %s1199_s26   ;;  %s859_s25 = sphi %s921_s25, %s1198_s25   ;;  %s855_s24 = sphi %s919_s24, %s1197_s24  }
   0x6   : > { %s944_s30 = sadd.s32 1, %s867_s27   ;;  %s30_s8 = sadd.s32 1, %s863_s26 }
   0x7   : > { %s27_s9 = ssub.s32 %s867_s27, %s944_s30  ;;  %p37_p0 = scmp.ne.s32.totalorder %s863_s26, %s859_s25 }
   0x8   : > { %p28_p1 = scmp.eq.s32.totalorder %s27_s9, 0  ;;  %p38_p2 = scmp.eq.s32.totalorder %s867_s27, 0 }
   0x9   : > { %p43_p3 = scmp.ne.s32.totalorder %s859_s25, %s855_s24  ;;  %p44_p4 = scmp.eq.s32.totalorder %s940_s28, 0 }
   0xa   : > { %s956_s10 = scalar_select %p28_p1, %s863_s26, %s30_s8  }
   0xb   : > { %p958_p5 = por %p38_p2, %p37_p0  ;;  %p962_p6 = por %p44_p4, %p43_p3 }
   0xc   : > { %p193_p7 = scmp.eq.s32.totalorder %s940_s28, 3  ;;  %p199_p8 = scmp.eq.s32.totalorder %s676_s29, 3 }
   0xd   : > { %p700_p9 = scmp.lt.s32.totalorder %s867_s27, 4  ;;  %s237_s15 = sand.u32 1, %s863_s26  }
   0xe   : > { %p968_p10 = por %p193_p7, %p37_p0  ;;  %p972_p11 = por %p199_p8, %p43_p3 }
   0xf   : > { %s680_s16 = sshll.u32 %s867_s27, 7  ;;  %s679_s17 = sshll.u32 %s237_s15, 3 }
  0x10   : > { %s1190_s13 = scalar_select %p968_p10, 1, 0 }
  0x11   : > { %s1191_s14 = scalar_select %p972_p11, 1, 0 }
  0x12   : > { %s981_s20 = scalar_lea.hbm %s1179_s0, %s680_s16  ;;  %s241_s21 = scalar_lea.vmem [#allocation2], %s679_s17 }
  0x13   : > { %s248_s22 = sshll.u32 %s241_s21, 4  ;;  %p985_p12 = pnand %p700_p9, %p958_p5  ;;  %s989_s22 = int_to_ptr.vmem [resolvable:$true] %s248_s22 }
  0x14   : > { %s238_s29 = scalar_lea.sflag [#allocation3], %s237_s15  ;;  %s771_s8 = scalar_lea.hbm %s981_s20, 128 }
  0x15   : > { %p772_p1 = scmp.ne.s32.totalorder %s981_s20, %s771_s8  ;;  %p773_p2 = pneg %p985_p12 }
  0x16   : > { %s776_s16 = scalar_lea.hbm %s1179_s0, 512  ;;  %p777_p5 = scmp.lt.u32.totalorder %s981_s20, %s1179_s0 }
  0x17   : > { %p774_p3 = pnand %p773_p2, %p772_p1  ;;  %p778_p7 = scmp.lt.u32.totalorder %s776_s16, %s771_s8 }
  0x18   : > { %p780_p9 = scmp.lt.u32.totalorder %s771_s8, %s981_s20 }
  0x19   : > { %p775_p4 = pneg %p774_p3  ;;  %p779_p8 = por %p778_p7, %p777_p5 }
  0x1b   : > { %p781_p13 = por %p780_p9, %p779_p8 }
  0x1d   : > { %p782_p0 = pnand %p781_p13, %p775_p4 }
  0x1f   : > { %785 = shalt.err (!%p782_p0)
}
  0x20   : > { %s786_s15 = scalar_lea.vmem %s989_s22, 128  ;;  %s869_s19 = smov [#allocation2]  }
  0x21   : > { %p787_p1 = scmp.ne.s32.totalorder %s989_s22, %s786_s15  ;;  %s791_s21 = sshll.u32 %s869_s19, 4  ;;  %s792_s21 = int_to_ptr.vmem [resolvable:$false] %s791_s21 }
  0x22   : > { %s793_s9 = scalar_lea.vmem %s792_s21, 256  ;;  %p794_p10 = scmp.lt.s32.totalorder %s989_s22, %s792_s21 }
  0x23   : > { %p789_p3 = pnand %p787_p1, %p773_p2  ;;  %p795_p5 = scmp.lt.s32.totalorder %s793_s9, %s786_s15 }
  0x25   : > { %p790_p11 = pneg %p789_p3  ;;  %p796_p7 = por %p795_p5, %p794_p10 }
  0x27   : > { %p797_p8 = pnand %p796_p7, %p790_p11 }
  0x29   : > { %800 = shalt.err (!%p797_p8)
}
  0x2a   : > { %695 = dma.hbm_to_vmem [thread:$0]  (!%p985_p12), %s981_s20, 128, %s989_s22, %s238_s29  }
  0x2b   : > { %p1193_p13 = scmp.lt.s32.totalorder %s867_s27, 5  ;;  %p1194_p0 = scmp.ge.s32.totalorder %s867_s27, 1 }
  0x2d   : > { %p254_p2 = pnand %p1194_p0, %p1193_p13 }
  0x2e   : > { %s1023_s8 = sand.u32 (!%p254_p2), 1, %s859_s25  }
  0x2f   : > { %257 = sbr.rel (%p254_p2) target bundleno = 867 (0x363), region = 48  ;;  %s682_s11 = sshll.u32 (!%p254_p2), %s1023_s8, 3 }
  0x30   : > { %s260_s16 = scalar_lea.sflag (!%p254_p2), [#allocation3], %s1023_s8  ;;  %s1029_s23 = scalar_lea.vmem (!%p254_p2), [#allocation2], %s682_s11 }
  0x36   : > { %846 = dma.done.wait (%p962_p6), %s260_s16, 128  }
  0x37   : > { %848 = vsyncadd (%p962_p6), %s260_s16, 4294967168  ;;  %v870_v0 = vmov 1   ;;  %v871_v1 = vmov 0   ;;  %v295_v2 = vld [vmem:[%s1180_s1] sm:$0xff]  ;;  %v872_v4 = vmov 2   ;;  %v873_v5 = vmov 3  }
  0x38   : > { %743 = vset.pattern.permute.xlu1 %v870_v0  ;;  %742 = vset.pattern.permute.xlu0 %v871_v1  ;;  %v296_v3 = vld [vmem:[%s1181_s2] sm:$0xff]  ;;  %v874_v6 = vmov 4   ;;  %v875_v7 = vmov 6   ;;  %v876_v8 = vmov 5   ;;  %v877_v9 = vmov 7   ;;  %s685_s20 = sshll.u32 %s940_s28, 7 }
  0x39   : > { %319 = vperm.xlu1 %743, %v295_v2   ;;  %309 = vperm.xlu0 %742, %v295_v2   ;;  %v312_v10 = vlaneseq  ;;  %v1052_v12 = vld [vmem:[%s1029_s23] sm:$0xff]  ;;  %s293_s22 = scalar_lea.vmem [#allocation5], %s682_s11  ;;  %s1136_s18 = scalar_lea.hbm %s1186_s7, %s685_s20 }
  0x3a   : > { %v301_v14 = vmax.f32 %v1052_v12, 0.0  ;;  %v298_v55 = vld [vmem:[%s1183_s4] sm:$0xff]  ;;  %s606_s29 = sshll.u32 %s293_s22, 4  ;;  %s593_s15 = scalar_lea.sflag [#allocation4], %s1023_s8  ;;  %s1138_s29 = int_to_ptr.vmem [resolvable:$true] %s606_s29 }
  0x3b   : > { %v313_v11 = vshrl.u32 %v312_v10, 7  ;;  %v297_v56 = vld [vmem:[%s1182_s3] sm:$0xff]  ;;  %s801_s19 = scalar_lea.vmem %s1138_s29, 128  ;;  %p1195_p10 = scmp.ne.s32.totalorder %s1190_s13, 0 }
  0x3c   : > { %v300_v61 = vld [vmem:[%s1185_s6] sm:$0xff]  ;;  %p802_p6 = scmp.ne.s32.totalorder %s1138_s29, %s801_s19  ;;  %s878_s28 = smov [#allocation5]  }
  0x3d   : > { %744 = vset.pattern.permute.xlu1 %v872_v4  ;;  %304 = vperm.xlu0 %742, %v296_v3   ;;  %v1054_v13 = vsub.s32 0, %v313_v11  ;;  %v1057_v15 = vsub.s32 1, %v313_v11  ;;  %v1060_v17 = vsub.s32 2, %v313_v11  ;;  %v1064_v23 = vsub.s32 3, %v313_v11  ;;  %v299_v62 = vld [vmem:[%s1184_s5] sm:$0xff]  ;;  %s805_s11 = sshll.u32 %s878_s28, 4  ;;  %s806_s11 = int_to_ptr.vmem [resolvable:$false] %s805_s11 }
  0x3e   : > { %329 = vperm.xlu1 %744, %v295_v2   ;;  %v1066_v25 = vsub.s32 4, %v313_v11  ;;  %v1070_v33 = vsub.s32 5, %v313_v11  ;;  %v1072_v34 = vsub.s32 6, %v313_v11  ;;  %v1076_v43 = vsub.s32 7, %v313_v11  ;;  %p803_p11 = pnand %p802_p6, %p1195_p10  ;;  %s807_s21 = scalar_lea.vmem %s806_s11, 256 }
  0x3f   : > { %v315_v16 = vrot.slane %v301_v14, %v1054_v13  ;;  %v325_v20 = vrot.slane %v301_v14, %v1057_v15  ;;  %v335_v22 = vrot.slane %v301_v14, %v1060_v17  ;;  %v345_v30 = vrot.slane %v301_v14, %v1064_v23  ;;  %p808_p4 = scmp.lt.s32.totalorder %s1138_s29, %s806_s11  ;;  %p809_p9 = scmp.lt.s32.totalorder %s807_s21, %s801_s19 }
  0x40   : > { %v355_v32 = vrot.slane %v301_v14, %v1066_v25  ;;  %v365_v41 = vrot.slane %v301_v14, %v1070_v33  ;;  %v375_v42 = vrot.slane %v301_v14, %v1072_v34  ;;  %v385_v49 = vrot.slane %v301_v14, %v1076_v43  ;;  %p804_p12 = pneg %p803_p11 }
  0x41   : > { %745 = vset.pattern.permute.xlu0 %v873_v5  ;;  %p810_p1 = por %p809_p9, %p808_p4 }
  0x42   : > { %746 = vset.pattern.permute.xlu1 %v874_v6  ;;  %339 = vperm.xlu0 %745, %v295_v2  }
  0x43   : > { %349 = vperm.xlu1 %746, %v295_v2   ;;  %p811_p3 = pnand %p810_p1, %p804_p12 }
  0x46   : > { %748 = vset.pattern.permute.xlu0 %v875_v7 }
  0x47   : > { %747 = vset.pattern.permute.xlu1 %v876_v8  ;;  %369 = vperm.xlu0 %748, %v295_v2  }
  0x48   : > { %359 = vperm.xlu1 %747, %v295_v2  }
  0x4b   : > { %750 = vset.pattern.permute.xlu0 %v871_v1 }
  0x4c   : > { %749 = vset.pattern.permute.xlu1 %v877_v9 }
  0x4d   : > { %379 = vperm.xlu1 %749, %v295_v2  }
  0x51   : > { %751 = vset.pattern.permute.xlu1 %v871_v1 }
  0xb8   : > { %v320_v18 = vpop.permute.xlu1 %319  ;;  %v310_v19 = vpop.permute.xlu0 %309 }
  0xb9   : > { %v316_v21 = vmul.f32 %v315_v16, %v310_v19  ;;  %v326_v26 = vmul.f32 %v325_v20, %v320_v18 }
  0xbc   : > { %v305_v24 = vpop.permute.xlu0 %304 }
  0xbd   : > { %v317_v27 = vadd.f32 %v316_v21, %v305_v24  ;;  %v330_v28 = vpop.permute.xlu1 %329 }
  0xbe   : > { %v336_v29 = vmul.f32 %v335_v22, %v330_v28 }
  0xbf   : > { %v327_v31 = vadd.f32 %v326_v26, %v317_v27 }
  0xc1   : > { %v337_v35 = vadd.f32 %v336_v29, %v327_v31  ;;  %v340_v36 = vpop.permute.xlu0 %339 }
  0xc2   : > { %v346_v37 = vmul.f32 %v345_v30, %v340_v36  ;;  %v350_v38 = vpop.permute.xlu1 %349 }
  0xc3   : > { %v356_v40 = vmul.f32 %v355_v32, %v350_v38 }
  0xc4   : > { %v347_v39 = vadd.f32 %v346_v37, %v337_v35 }
  0xc6   : > { %v370_v44 = vpop.permute.xlu0 %369  ;;  %v357_v46 = vadd.f32 %v356_v40, %v347_v39 }
  0xc7   : > { %v360_v45 = vpop.permute.xlu1 %359  ;;  %v376_v48 = vmul.f32 %v375_v42, %v370_v44 }
  0xc8   : > { %v366_v47 = vmul.f32 %v365_v41, %v360_v45 }
  0xca   : > { %v367_v50 = vadd.f32 %v366_v47, %v357_v46 }
  0xcc   : > { %v377_v51 = vadd.f32 %v376_v48, %v367_v50  ;;  %v380_v52 = vpop.permute.xlu1 %379 }
  0xcd   : > { %v386_v53 = vmul.f32 %v385_v49, %v380_v52 }
  0xcf   : > { %v387_v54 = vadd.f32 %v386_v53, %v377_v51 }
  0xd1   : > { %388 = vadd.xlane.f32.xlu1 %v387_v54 }
  0xe2   : > { %405 = vperm.xlu1 %751, %v298_v55  }
  0xe6   : > { %752 = vset.pattern.permute.xlu1 %v870_v0 }
  0xe7   : > { %420 = vperm.xlu1 %752, %v297_v56  }
  0xeb   : > { %753 = vset.pattern.permute.xlu1 %v872_v4 }
  0xec   : > { %430 = vperm.xlu1 %753, %v297_v56  }
  0xf0   : > { %754 = vset.pattern.permute.xlu1 %v873_v5 }
  0xf1   : > { %440 = vperm.xlu1 %754, %v297_v56  }
  0xf5   : > { %755 = vset.pattern.permute.xlu1 %v874_v6 }
  0xf6   : > { %450 = vperm.xlu1 %755, %v297_v56  }
  0xfa   : > { %756 = vset.pattern.permute.xlu1 %v876_v8 }
  0xfb   : > { %460 = vperm.xlu1 %756, %v297_v56  }
  0xff   : > { %757 = vset.pattern.permute.xlu1 %v875_v7 }
 0x100   : > { %470 = vperm.xlu1 %757, %v297_v56  }
 0x104   : > { %758 = vset.pattern.permute.xlu1 %v877_v9 }
 0x105   : > { %480 = vperm.xlu1 %758, %v297_v56  }
 0x109   : > { %759 = vset.pattern.permute.xlu1 %v871_v1 }
 0x10a   : > { %505 = vperm.xlu1 %759, %v300_v61   ;;  %v536_v61 = vrot.slane %v1052_v12, %v1060_v17 }
 0x10e   : > { %761 = vset.pattern.permute.xlu1 %v872_v4 }
 0x10f   : > { %530 = vperm.xlu1 %761, %v299_v62  }
 0x113   : > { %762 = vset.pattern.permute.xlu1 %v873_v5 }
 0x114   : > { %540 = vperm.xlu1 %762, %v299_v62  }
 0x118   : > { %764 = vset.pattern.permute.xlu1 %v876_v8 }
 0x119   : > { %560 = vperm.xlu1 %764, %v299_v62  }
 0x11d   : > { %765 = vset.pattern.permute.xlu1 %v875_v7 }
 0x15e   : > { %v389_v57 = vpop.xlane.xlu1 %388 }
 0x15f   : > { %v391_v58 = vmul.f32 0.0078125, %v389_v57 }
 0x161   : > { %v392_v59 = vsub.f32 %v387_v54, %v391_v58  ;;  %v516_v58 = vrot.slane %v1052_v12, %v1054_v13 }
 0x162   : > { %v406_v63 = vpop.permute.xlu1 %405 }
 0x163   : > { %v393_v60 = vmul.f32 %v392_v59, %v392_v59 }
 0x165   : > { %394 = vadd.xlane.f32.xlu0 %v393_v60 }
 0x166   : > { %v421_v1 = vpop.permute.xlu1 %420 }
 0x16b   : > { %v431_v11 = vpop.permute.xlu1 %430 }
 0x170   : > { %v441_v14 = vpop.permute.xlu1 %440 }
 0x175   : > { %v451_v4 = vpop.permute.xlu1 %450 }
 0x17a   : > { %v461_v7 = vpop.permute.xlu1 %460 }
 0x17b   : > { %410 = vperm.xlu0 %750, %v297_v56  }
 0x17f   : > { %v471_v32 = vpop.permute.xlu1 %470 }
 0x184   : > { %v481_v45 = vpop.permute.xlu1 %480 }
 0x189   : > { %v506_v55 = vpop.permute.xlu1 %505 }
 0x18e   : > { %v531_v57 = vpop.permute.xlu1 %530 }
 0x1f2   : > { %v395_v2 = vpop.xlane.xlu0 %394 }
 0x1f3   : > { %v396_v3 = vmul.f32 0.0078125, %v395_v2 }
 0x1f5   : > { %v397_v10 = vadd.f32 1e-05, %v396_v3  ;;  %v546_v3 = vrot.slane %v1052_v12, %v1064_v23 }
 0x1f7   : > { %767 = vrsqrt.f32 %v397_v10 }
 0x1fa   : > { %v411_v20 = vpop.permute.xlu0 %410 }
 0x201   : > { %v768_v16 = vpop.eup %767 }
 0x202   : > { %v399_v18 = vmul.f32 %v768_v16, %v392_v59  ;;  %v541_v59 = vpop.permute.xlu1 %540 }
 0x204   : > { %vm400_vm0 = vcmp.ge.f32.partialorder %v399_v18, 0.0  ;;  %v401_v19 = vmul.f32 0.4, %v399_v18 }
 0x206   : > { %v402_v5 = vsel %vm400_vm0, %v399_v18, %v401_v19 }
 0x207   : > { %v416_v8 = vrot.slane %v402_v5, %v1054_v13  ;;  %v426_v21 = vrot.slane %v402_v5, %v1057_v15  ;;  %v436_v22 = vrot.slane %v402_v5, %v1060_v17  ;;  %v446_v26 = vrot.slane %v402_v5, %v1064_v23 }
 0x208   : > { %v456_v30 = vrot.slane %v402_v5, %v1066_v25  ;;  %v466_v36 = vrot.slane %v402_v5, %v1070_v33  ;;  %v476_v39 = vrot.slane %v402_v5, %v1072_v34  ;;  %v486_v42 = vrot.slane %v402_v5, %v1076_v43 }
 0x209   : > { %v417_v24 = vmul.f32 %v416_v8, %v411_v20  ;;  %v427_v28 = vmul.f32 %v426_v21, %v421_v1  ;;  %v437_v29 = vmul.f32 %v436_v22, %v431_v11  ;;  %v447_v35 = vmul.f32 %v446_v26, %v441_v14  ;;  %v561_v1 = vpop.permute.xlu1 %560 }
 0x20a   : > { %v457_v38 = vmul.f32 %v456_v30, %v451_v4  ;;  %v467_v41 = vmul.f32 %v466_v36, %v461_v7  ;;  %v477_v46 = vmul.f32 %v476_v39, %v471_v32  ;;  %v487_v48 = vmul.f32 %v486_v42, %v481_v45 }
 0x20b   : > { %v418_v27 = vadd.f32 %v417_v24, %v406_v63  ;;  %v547_v13 = vmul.f32 %v546_v3, %v541_v59  ;;  %v566_v17 = vrot.slane %v1052_v12, %v1070_v33  ;;  %v576_v5 = vrot.slane %v1052_v12, %v1072_v34 }
 0x20d   : > { %v428_v31 = vadd.f32 %v427_v28, %v418_v27  ;;  %v567_v8 = vmul.f32 %v566_v17, %v561_v1 }
 0x20f   : > { %v438_v37 = vadd.f32 %v437_v29, %v428_v31 }
 0x211   : > { %v448_v40 = vadd.f32 %v447_v35, %v438_v37 }
 0x213   : > { %v458_v44 = vadd.f32 %v457_v38, %v448_v40 }
 0x215   : > { %v468_v47 = vadd.f32 %v467_v41, %v458_v44 }
 0x217   : > { %v478_v49 = vadd.f32 %v477_v46, %v468_v47 }
 0x219   : > { %v488_v50 = vadd.f32 %v487_v48, %v478_v49 }
 0x21b   : > { %489 = vadd.xlane.f32.xlu0 %v488_v50 }
 0x231   : > { %510 = vperm.xlu0 %750, %v299_v62  }
 0x235   : > { %760 = vset.pattern.permute.xlu0 %v870_v0  ;;  %v526_v0 = vrot.slane %v1052_v12, %v1057_v15  ;;  %v556_v15 = vrot.slane %v1052_v12, %v1066_v25  ;;  %v586_v25 = vrot.slane %v1052_v12, %v1076_v43 }
 0x236   : > { %520 = vperm.xlu0 %760, %v299_v62  }
 0x23a   : > { %763 = vset.pattern.permute.xlu0 %v874_v6 }
 0x23b   : > { %550 = vperm.xlu0 %763, %v299_v62  }
 0x23f   : > { %766 = vset.pattern.permute.xlu0 %v877_v9 }
 0x240   : > { %580 = vperm.xlu0 %766, %v299_v62  }
 0x2a8   : > { %v490_v51 = vpop.xlane.xlu0 %489 }
 0x2a9   : > { %v491_v52 = vmul.f32 0.0078125, %v490_v51 }
 0x2ab   : > { %v492_v53 = vsub.f32 %v488_v50, %v491_v52 }
 0x2ad   : > { %v493_v54 = vmul.f32 %v492_v53, %v492_v53 }
 0x2af   : > { %494 = vadd.xlane.f32.xlu1 %v493_v54 }
 0x2b0   : > { %v511_v56 = vpop.permute.xlu0 %510 }
 0x2b1   : > { %v517_v60 = vmul.f32 %v516_v58, %v511_v56 }
 0x2b3   : > { %v518_v63 = vadd.f32 %v517_v60, %v506_v55 }
 0x2b5   : > { %v521_v6 = vpop.permute.xlu0 %520 }
 0x2b6   : > { %v527_v9 = vmul.f32 %v526_v0, %v521_v6 }
 0x2b8   : > { %v528_v2 = vadd.f32 %v527_v9, %v518_v63 }
 0x2ba   : > { %v551_v16 = vpop.permute.xlu0 %550 }
 0x2bb   : > { %v557_v19 = vmul.f32 %v556_v15, %v551_v16 }
 0x2bf   : > { %v581_v7 = vpop.permute.xlu0 %580 }
 0x2c0   : > { %570 = vperm.xlu1 %765, %v299_v62   ;;  %v537_v62 = vmul.f32 %v536_v61, %v531_v57  ;;  %v587_v27 = vmul.f32 %v586_v25, %v581_v7 }
 0x2c2   : > { %v538_v11 = vadd.f32 %v537_v62, %v528_v2 }
 0x2c4   : > { %v548_v4 = vadd.f32 %v547_v13, %v538_v11 }
 0x2c6   : > { %v558_v20 = vadd.f32 %v557_v19, %v548_v4 }
 0x2c8   : > { %v568_v22 = vadd.f32 %v567_v8, %v558_v20 }
 0x33c   : > { %v495_v10 = vpop.xlane.xlu1 %494 }
 0x33d   : > { %v496_v14 = vmul.f32 0.0078125, %v495_v10 }
 0x33f   : > { %v497_v18 = vadd.f32 1e-05, %v496_v14 }
 0x340   : > { %v571_v23 = vpop.permute.xlu1 %570 }
 0x341   : > { %769 = vrsqrt.f32 %v497_v18  ;;  %v577_v21 = vmul.f32 %v576_v5, %v571_v23 }
 0x343   : > { %v578_v26 = vadd.f32 %v577_v21, %v568_v22 }
 0x345   : > { %v588_v34 = vadd.f32 %v587_v27, %v578_v26 }
 0x34b   : > { %v770_v24 = vpop.eup %769 }
 0x34c   : > { %v499_v33 = vmul.f32 %v770_v24, %v492_v53 }
 0x34e   : > { %vm500_vm1 = vcmp.ge.f32.partialorder %v499_v33, 0.0  ;;  %v501_v28 = vmul.f32 0.4, %v499_v33 }
 0x350   : > { %v502_v29 = vsel %vm500_vm1, %v499_v33, %v501_v28 }
 0x351   : > { %v589_v30 = vadd.f32 %v588_v34, %v502_v29 }
 0x353   : > { %v590_v31 = vmax.f32 %v589_v30, 0.0 }
 0x355   : > { %591 = vst [vmem:[%s293_s22] sm:$0xff] %v590_v31 }
 0x356   : > { %814 = shalt.err (!%p811_p3)
}
 0x357   : > { %s815_s8 = scalar_lea.hbm %s1136_s18, 128  ;;  %s819_s23 = scalar_lea.hbm %s1186_s7, 512 }
 0x358   : > { %p816_p5 = scmp.ne.s32.totalorder %s1136_s18, %s815_s8  ;;  %p820_p13 = scmp.lt.u32.totalorder %s1136_s18, %s1186_s7 }
 0x359   : > { %p821_p0 = scmp.lt.u32.totalorder %s819_s23, %s815_s8  ;;  %p823_p6 = scmp.lt.u32.totalorder %s815_s8, %s1136_s18 }
 0x35a   : > { %p817_p7 = pnand %p816_p5, %p1195_p10 }
 0x35b   : > { %p822_p2 = por %p821_p0, %p820_p13 }
 0x35c   : > { %p818_p8 = pneg %p817_p7 }
 0x35d   : > { %p824_p11 = por %p823_p6, %p822_p2 }
 0x35f   : > { %p825_p12 = pnand %p824_p11, %p818_p8 }
 0x361   : > { %828 = shalt.err (!%p825_p12)
}
 0x362   : > { %690 = dma.vmem_to_hbm [thread:$0]  (%p1195_p10), %s1138_s29, 128, %s1136_s18, %s593_s15  }
 0x363 PF: > { %p701_p4 = scmp.ge.s32.totalorder %s867_s27, 2  ;;  %s618_s17 = sand.u32 1, %s855_s24  }
 0x364   : > { %p1196_p9 = scmp.ne.s32.totalorder %s1191_s14, 0  ;;  %s619_s12 = scalar_lea.sflag [#allocation4], %s618_s17 }
 0x366   : > { %p697_p1 = pnand %p701_p4, %p1196_p9 }
 0x368   : > { %850 = dma.done.wait (!%p697_p1), %s619_s12, 128  }
 0x369   : > { %852 = vsyncadd (!%p697_p1), %s619_s12, 4294967168  ;;  %p20_p3 = scmp.ge.s32.totalorder %s944_s30, 6   ;;  %s1197_s24 = smov %s859_s25 }
 0x36a   : > { %s1198_s25 = smov %s863_s26  ;;  %s1199_s26 = smov %s956_s10 }
 0x36b   : > { %s1200_s27 = smov %s944_s30  ;;  %22 = sbr.rel (!%p20_p3) target bundleno = 5 (0x5), region = 93 }
 0x372   :  { %624 = vsyncpa [#allocation3], 1 }
 0x373   :  { %626 = vsyncpa [#allocation3 + $0x1], 1 }
 0x374   :  { %627 = vsyncpa [#allocation4], 1 }
 0x375   :  { %629 = vsyncpa [#allocation4 + $0x1], 1 }

</bundles_post_ra>
